<compile_context>
chip_gen: v5e
topology: v5e:2x2
jax: 0.10.0
libtpu: 0.0.40
codegen_flags: <defaults>
</compile_context>

<pallas_src>
import functools

import jax
import jax.numpy as jnp
from jax import lax
from jax.experimental import pallas as pl
from jax.experimental.pallas import tpu as pltpu

SMOOTH = 1.0
LANES = 128
MAX_TILE_ROWS = 4096                   # (4096,128) f32 block = 2 MiB
VMEM_LIMIT_BYTES = 32 * 1024 * 1024    # <= physical VMEM on v5e/v6e/v7x


def _num_tensorcores_per_device() -> int:
    """Best-effort: 2 on 2-TensorCore parts (v7x / megacore v4/v5p), else 1."""
    try:
        kind = jax.devices()[0].device_kind.lower()
    except Exception:
        return 1
    if ("v7" in kind) or ("v4" in kind) or ("v5p" in kind):
        return 2
    return 1


def _dice_kernel(x_ref, t_ref, out_ref, acc_i_ref, acc_u_ref, *,
                 tile_rows, nblocks, valid_rows, has_partial, has_dup):
    c = pl.program_id(0)               # core-split index
    s = pl.program_id(1)               # step within this split
    steps = pl.num_programs(1)
    blk = c * steps + s                # logical (unclamped) block index

    @pl.when(s == 0)
    def _init():
        acc_i_ref[...] = jnp.zeros_like(acc_i_ref)
        acc_u_ref[...] = jnp.zeros_like(acc_u_ref)

    def _accumulate(x, t):
        # vreg-sized (1,128) lane partials: one tiny load+store per grid step
        # instead of a block-shaped accumulator touched once per input vreg.
        acc_i_ref[...] += jnp.sum(x * t, axis=0, keepdims=True)
        acc_u_ref[...] += jnp.sum(x + t, axis=0, keepdims=True)

    def _full_block():
        # Widen narrow dtypes in-kernel (free under the HBM-bound roofline).
        _accumulate(x_ref[...].astype(jnp.float32),
                    t_ref[...].astype(jnp.float32))

    if has_partial:
        last = nblocks - 1

        # Interior blocks: pure stream, no mask, no iota.
        @pl.when(blk < last)
        def _interior():
            _full_block()

        # The single partial (last) block: zero rows >= valid_rows.
        @pl.when(blk == last)
        def _partial():
            x = x_ref[...].astype(jnp.float32)
            t = t_ref[...].astype(jnp.float32)
            rid = last * tile_rows + lax.broadcasted_iota(
                jnp.int32, (tile_rows, LANES), 0)
            m = rid < valid_rows
            _accumulate(jnp.where(m, x, 0.0), jnp.where(m, t, 0.0))
        # blk > last (duplicated OOB step of the last split): skipped entirely.
    elif has_dup:
        @pl.when(blk < nblocks)
        def _guarded():
            _full_block()
    else:
        _full_block()

    @pl.when(s == steps - 1)
    def _finalize():
        out_ref[0, 0:1, :] = acc_i_ref[...]
        out_ref[0, 1:2, :] = acc_u_ref[...]


def dice_loss_sigmoid(x, target, smooth=SMOOTH, *,
                      max_tile_rows=MAX_TILE_ROWS, nsplit=None):
    """x: float array (any shape, e.g. NCHW); target: same shape, any real/int dtype."""
    x = jnp.asarray(x).reshape(-1)
    t = jnp.asarray(target).reshape(-1)

    # Normalize dtypes the TPU kernel can't (or shouldn't) stream.
    if (not jnp.issubdtype(x.dtype, jnp.floating)) or x.dtype.itemsize > 4:
        x = x.astype(jnp.float32)          # ints / f64 -> f32 (no f64 on Mosaic)
    if t.dtype == jnp.bool_:
        t = t.astype(jnp.int8)
    elif t.dtype.itemsize > 4:             # i64 / f64 -> 32-bit
        t = t.astype(jnp.float32 if jnp.issubdtype(t.dtype, jnp.floating)
                     else jnp.int32)

    total = x.shape[0]
    if total == 0:
        return jnp.float32(0.0)            # (2*0+s)/(0+s) = 1 -> loss 0

    # Only a sub-128 remainder ever needs zero padding (sum-neutral).
    # TODO(synk): fully zero-copy tail (sum the <128-elem remainder in the wrapper).
    rem = total % LANES
    if rem:
        pad = LANES - rem
        x = jnp.pad(x, (0, pad))
        t = jnp.pad(t, (0, pad))

    rows = x.shape[0] // LANES
    x2 = x.reshape(rows, LANES)            # row-major reshape: no HBM copy
    t2 = t.reshape(rows, LANES)

    # Block covers the whole array when small, else max_tile_rows (mult. of 8).
    if rows <= max_tile_rows:
        tile_rows = rows
    else:
        tile_rows = max(8, (max_tile_rows // 8) * 8)
    nblocks = pl.cdiv(rows, tile_rows)

    # Leading split axis: only worth it on 2-TensorCore chips (v7x, v4/v5p);
    # on single-TC v5e/v6e it degenerates to a size-1 axis (no overhead paths).
    if nsplit is None:
        nsplit = _num_tensorcores_per_device()
    nsplit = max(1, min(int(nsplit), nblocks))
    steps = pl.cdiv(nblocks, nsplit)

    has_partial = (rows % tile_rows) != 0
    has_dup = (nsplit * steps) != nblocks

    def in_index_map(c, s):
        blk = c * steps + s
        if has_dup:
            # Clamp duplicated OOB steps of the last split onto its final
            # block: same block index as the previous step -> the re-fetch is
            # elided, and the kernel skips compute for blk >= nblocks.
            blk = jnp.minimum(blk, nblocks - 1)
        return (blk, 0)

    out = pl.pallas_call(
        functools.partial(_dice_kernel, tile_rows=tile_rows, nblocks=nblocks,
                          valid_rows=rows, has_partial=has_partial,
                          has_dup=has_dup),
        out_shape=jax.ShapeDtypeStruct((nsplit, 2, LANES), jnp.float32),
        grid_spec=pltpu.PrefetchScalarGridSpec(
            num_scalar_prefetch=0,
            grid=(nsplit, steps),
            in_specs=[
                pl.BlockSpec((tile_rows, LANES), in_index_map),
                pl.BlockSpec((tile_rows, LANES), in_index_map),
            ],
            out_specs=pl.BlockSpec((1, 2, LANES), lambda c, s: (c, 0, 0)),
            scratch_shapes=[
                pltpu.VMEM((1, LANES), jnp.float32),   # sum(x*t) lane partials
                pltpu.VMEM((1, LANES), jnp.float32),   # sum(x)+sum(t) lane partials
            ],
        ),
        compiler_params=pltpu.CompilerParams(
            dimension_semantics=("parallel", "arbitrary"),
            vmem_limit_bytes=VMEM_LIMIT_BYTES,
        ),
    )(x2, t2)

    # Tiny epilogue: combine per-split/lane partials and apply the dice formula.
    intersect = jnp.sum(out[:, 0, :])
    union = jnp.sum(out[:, 1, :])
    dice = (2.0 * intersect + smooth) / (union + smooth)
    return 1.0 - dice


def _ref_loss(x, t, smooth=SMOOTH):
    xf = jnp.asarray(x).astype(jnp.float32)
    tf = jnp.asarray(t).astype(jnp.float32)
    intersect = jnp.sum(xf * tf)
    union = jnp.sum(xf) + jnp.sum(tf)
    return 1.0 - (2.0 * intersect + smooth) / (union + smooth)


if __name__ == "__main__":
    key = jax.random.PRNGKey(0)
    k1, k2, k3, k4, k5, k6, k7, k8 = jax.random.split(key, 8)

    # 1) canonical small NCHW case (numel % 128 == 0, single block, no masking)
    x1 = jax.nn.sigmoid(jax.random.normal(k1, (2, 4, 16, 16), dtype=jnp.float32))
    t1 = (jax.random.uniform(k2, (2, 4, 16, 16)) > 0.5).astype(jnp.int32)
    l1 = dice_loss_sigmoid(x1, t1)
    jax.block_until_ready(l1)
    assert jnp.allclose(l1, _ref_loss(x1, t1), atol=1e-5, rtol=1e-4), (l1, _ref_loss(x1, t1))

    # 2) odd-sized tensor: exercises the sub-128 remainder padding path
    x2 = jax.nn.sigmoid(jax.random.normal(k3, (3, 5, 7, 11), dtype=jnp.float32))
    t2 = (jax.random.uniform(k4, (3, 5, 7, 11)) > 0.5).astype(jnp.int32)
    l2 = dice_loss_sigmoid(x2, t2)
    jax.block_until_ready(l2)
    assert jnp.allclose(l2, _ref_loss(x2, t2), atol=1e-5, rtol=1e-4), (l2, _ref_loss(x2, t2))

    # 3) forced multi-block path, 2-way split, duplicated (skipped) OOB step,
    #    int8 target streamed narrow and widened in-kernel
    x3 = jax.nn.sigmoid(jax.random.normal(k5, (2, 4, 40, 128), dtype=jnp.float32))
    t3 = (jax.random.uniform(k6, (2, 4, 40, 128)) > 0.5).astype(jnp.int8)
    l3 = dice_loss_sigmoid(x3, t3, max_tile_rows=64, nsplit=2)
    jax.block_until_ready(l3)
    assert jnp.allclose(l3, _ref_loss(x3, t3), atol=1e-5, rtol=1e-4), (l3, _ref_loss(x3, t3))

    # 4) forced multi-block path with a partial (masked) last block + dup step
    x4 = jax.nn.sigmoid(jax.random.normal(k7, (2, 4, 40, 128), dtype=jnp.float32))
    t4 = (jax.random.uniform(k8, (2, 4, 40, 128)) > 0.5).astype(jnp.int8)
    l4 = dice_loss_sigmoid(x4, t4, max_tile_rows=48, nsplit=2)
    jax.block_until_ready(l4)
    assert jnp.allclose(l4, _ref_loss(x4, t4), atol=1e-5, rtol=1e-4), (l4, _ref_loss(x4, t4))

    # 5) default auto-tiling / auto-split on a slightly larger tensor
    x5 = jax.nn.sigmoid(jax.random.normal(k1, (2, 4, 320, 128), dtype=jnp.float32))
    t5 = (jax.random.uniform(k2, (2, 4, 320, 128)) > 0.5).astype(jnp.int8)
    l5 = dice_loss_sigmoid(x5, t5)
    jax.block_until_ready(l5)
    assert jnp.allclose(l5, _ref_loss(x5, t5), atol=1e-5, rtol=1e-4), (l5, _ref_loss(x5, t5))

    print("KERNEL_OK")
</pallas_src>

<mosaic_0001>
module attributes {stable_mosaic.version = 11 : i64} {
  func.func @_dice_kernel(%arg0: i32, %arg1: i32, %arg2: memref<16x128xf32, #tpu.memory_space<vmem>>, %arg3: memref<16x128xi32, #tpu.memory_space<vmem>>, %arg4: memref<1x2x128xf32, #tpu.memory_space<vmem>>, %arg5: memref<1x128xf32, #tpu.memory_space<vmem>>, %arg6: memref<1x128xf32, #tpu.memory_space<vmem>>) attributes {dimension_semantics = [#tpu.dimension_semantics<parallel>, #tpu.dimension_semantics<arbitrary>], iteration_bounds = array<i64: 1, 1>, scalar_prefetch = 0 : i64, scratch_operands = 2 : i64, tpu.core_type = #tpu.core_type<tc>, window_params = [{transform_indices = @transform_0, window_bounds = array<i64: 16, 128>}, {transform_indices = @transform_1, window_bounds = array<i64: 16, 128>}, {transform_indices = @transform_2, window_bounds = array<i64: 1, 2, 128>}]} {
    %c0_i32 = arith.constant 0 : i32
    %0 = arith.cmpi eq, %arg1, %c0_i32 : i32
    %1 = arith.extui %0 : i1 to i32
    %c0_i32_0 = arith.constant 0 : i32
    %2 = arith.cmpi ne, %1, %c0_i32_0 : i32
    scf.if %2 {
      %cst_15 = arith.constant 0.000000e+00 : f32
      %21 = vector.broadcast %cst_15 : f32 to vector<1x128xf32>
      %c0_16 = arith.constant 0 : index
      %c0_17 = arith.constant 0 : index
      %22 = vector.load %arg5[%c0_16, %c0_17] : memref<1x128xf32, #tpu.memory_space<vmem>>, vector<1x128xf32>
      tpu.vector_store %arg5[%c0_16, %c0_17], %21 {strides = array<i32>} : memref<1x128xf32, #tpu.memory_space<vmem>>, vector<1x128xf32>,
      %cst_18 = arith.constant 0.000000e+00 : f32
      %23 = vector.broadcast %cst_18 : f32 to vector<1x128xf32>
      %c0_19 = arith.constant 0 : index
      %c0_20 = arith.constant 0 : index
      %24 = vector.load %arg6[%c0_19, %c0_20] : memref<1x128xf32, #tpu.memory_space<vmem>>, vector<1x128xf32>
      tpu.vector_store %arg6[%c0_19, %c0_20], %23 {strides = array<i32>} : memref<1x128xf32, #tpu.memory_space<vmem>>, vector<1x128xf32>,
    } else {
    }
    %c0 = arith.constant 0 : index
    %c0_1 = arith.constant 0 : index
    %3 = vector.load %arg2[%c0, %c0_1] : memref<16x128xf32, #tpu.memory_space<vmem>>, vector<16x128xf32>
    %c0_2 = arith.constant 0 : index
    %c0_3 = arith.constant 0 : index
    %4 = vector.load %arg3[%c0_2, %c0_3] : memref<16x128xi32, #tpu.memory_space<vmem>>, vector<16x128xi32>
    %5 = arith.sitofp %4 : vector<16x128xi32> to vector<16x128xf32>
    %c0_4 = arith.constant 0 : index
    %c0_5 = arith.constant 0 : index
    %6 = vector.load %arg5[%c0_4, %c0_5] : memref<1x128xf32, #tpu.memory_space<vmem>>, vector<1x128xf32>
    %7 = arith.mulf %3, %5 : vector<16x128xf32>
    %cst = arith.constant dense<0.000000e+00> : vector<128xf32>
    %8 = vector.multi_reduction <add>, %7, %cst [0] : vector<16x128xf32> to vector<128xf32>
    %9 = vector.shape_cast %8 : vector<128xf32> to vector<1x128xf32>
    %10 = arith.addf %6, %9 : vector<1x128xf32>
    %c0_6 = arith.constant 0 : index
    %c0_7 = arith.constant 0 : index
    %11 = vector.load %arg5[%c0_6, %c0_7] : memref<1x128xf32, #tpu.memory_space<vmem>>, vector<1x128xf32>
    tpu.vector_store %arg5[%c0_6, %c0_7], %10 {strides = array<i32>} : memref<1x128xf32, #tpu.memory_space<vmem>>, vector<1x128xf32>,
    %c0_8 = arith.constant 0 : index
    %c0_9 = arith.constant 0 : index
    %12 = vector.load %arg6[%c0_8, %c0_9] : memref<1x128xf32, #tpu.memory_space<vmem>>, vector<1x128xf32>
    %13 = arith.addf %3, %5 : vector<16x128xf32>
    %cst_10 = arith.constant dense<0.000000e+00> : vector<128xf32>
    %14 = vector.multi_reduction <add>, %13, %cst_10 [0] : vector<16x128xf32> to vector<128xf32>
    %15 = vector.shape_cast %14 : vector<128xf32> to vector<1x128xf32>
    %16 = arith.addf %12, %15 : vector<1x128xf32>
    %c0_11 = arith.constant 0 : index
    %c0_12 = arith.constant 0 : index
    %17 = vector.load %arg6[%c0_11, %c0_12] : memref<1x128xf32, #tpu.memory_space<vmem>>, vector<1x128xf32>
    tpu.vector_store %arg6[%c0_11, %c0_12], %16 {strides = array<i32>} : memref<1x128xf32, #tpu.memory_space<vmem>>, vector<1x128xf32>,
    %c0_i32_13 = arith.constant 0 : i32
    %18 = arith.cmpi eq, %arg1, %c0_i32_13 : i32
    %19 = arith.extui %18 : i1 to i32
    %c0_i32_14 = arith.constant 0 : i32
    %20 = arith.cmpi ne, %19, %c0_i32_14 : i32
    scf.if %20 {
      %c0_15 = arith.constant 0 : index
      %c0_16 = arith.constant 0 : index
      %21 = vector.load %arg5[%c0_15, %c0_16] : memref<1x128xf32, #tpu.memory_space<vmem>>, vector<1x128xf32>
      %c0_17 = arith.constant 0 : index
      %c0_18 = arith.constant 0 : index
      %c0_19 = arith.constant 0 : index
      %22 = vector.load %arg4[%c0_17, %c0_18, %c0_19] : memref<1x2x128xf32, #tpu.memory_space<vmem>>, vector<1x1x128xf32>
      %23 = vector.shape_cast %22 : vector<1x1x128xf32> to vector<1x128xf32>
      %24 = vector.shape_cast %21 : vector<1x128xf32> to vector<1x1x128xf32>
      tpu.vector_store %arg4[%c0_17, %c0_18, %c0_19], %24 {strides = array<i32>} : memref<1x2x128xf32, #tpu.memory_space<vmem>>, vector<1x1x128xf32>,
      %c0_20 = arith.constant 0 : index
      %c0_21 = arith.constant 0 : index
      %25 = vector.load %arg6[%c0_20, %c0_21] : memref<1x128xf32, #tpu.memory_space<vmem>>, vector<1x128xf32>
      %c0_22 = arith.constant 0 : index
      %c1 = arith.constant 1 : index
      %c0_23 = arith.constant 0 : index
      %26 = vector.load %arg4[%c0_22, %c1, %c0_23] : memref<1x2x128xf32, #tpu.memory_space<vmem>>, vector<1x1x128xf32>
      %27 = vector.shape_cast %26 : vector<1x1x128xf32> to vector<1x128xf32>
      %28 = vector.shape_cast %25 : vector<1x128xf32> to vector<1x1x128xf32>
      tpu.vector_store %arg4[%c0_22, %c1, %c0_23], %28 {strides = array<i32>} : memref<1x2x128xf32, #tpu.memory_space<vmem>>, vector<1x1x128xf32>,
    } else {
    }
    return
  }
  func.func @transform_0(%arg0: i32, %arg1: i32) -> (i32, i32) {
    %c1_i32 = arith.constant 1 : i32
    %0 = arith.muli %arg0, %c1_i32 : i32
    %1 = arith.addi %0, %arg1 : i32
    %c0_i32 = arith.constant 0 : i32
    %c0_i32_0 = arith.constant 0 : i32
    return %1, %c0_i32 : i32, i32
  }
  func.func @transform_1(%arg0: i32, %arg1: i32) -> (i32, i32) {
    %c1_i32 = arith.constant 1 : i32
    %0 = arith.muli %arg0, %c1_i32 : i32
    %1 = arith.addi %0, %arg1 : i32
    %c0_i32 = arith.constant 0 : i32
    %c0_i32_0 = arith.constant 0 : i32
    return %1, %c0_i32 : i32, i32
  }
  func.func @transform_2(%arg0: i32, %arg1: i32) -> (i32, i32, i32) {
    %c0_i32 = arith.constant 0 : i32
    %c0_i32_0 = arith.constant 0 : i32
    %c0_i32_1 = arith.constant 0 : i32
    return %arg0, %c0_i32, %c0_i32_0 : i32, i32, i32
  }
}

</mosaic_0001>

<bundles_post_ra>
// kernel: tpu_custom_call.1
= control target key start
LH: loop header
LB: loop body
LE: loop exit
PB: predicated region body
PF: predicated region fallthrough
CT: control target
= control target key end

     0   :  { %7 = vsyncpa [#allocation5], 0  ;;  %s231_s0 = inlined_call_operand.hbm [shape: f32[16,128], index: 0, kind: input, shape index: {}]   ;;  %s232_s1 = inlined_call_operand.hbm [shape: s32[16,128], index: 1, kind: input, shape index: {}]   ;;  %s233_s2 = inlined_call_operand.hbm [shape: f32[1,2,128], index: 2, kind: output, shape index: {}]  }
   0x1   :  { %8 = vsyncpa [#allocation8], 0 }
   0x2   :  { %9 = vsyncpa [#allocation6], 0  ;;  %s18_s11 = sshll.u32 %s231_s0, 4  ;;  %s201_s12 = smov [#allocation4]   ;;  %s19_s11 = int_to_ptr.hbm [resolvable:$true] %s18_s11 }
   0x3   :  { %s20_s13 = sshll.u32 %s201_s12, 4  ;;  %s35_s16 = sshll.u32 %s232_s1, 4  ;;  %s21_s13 = int_to_ptr.vmem [resolvable:$true] %s20_s13  ;;  %s36_s16 = int_to_ptr.hbm [resolvable:$true] %s35_s16 }
   0x4   :  { %s202_s17 = smov 128   ;;  %s203_s18 = smov 8  }
   0x5   :  { %26 = dma.hbm_to_vmem [thread:$0]  %s19_s11, 256, %s21_s13, [#allocation5], %s202_s17, %s202_s17, %s203_s18  }
   0x6   :  { %s204_s19 = smov [#allocation7]  }
   0x7   :  { %s37_s20 = sshll.u32 %s204_s19, 4  ;;  %s38_s20 = int_to_ptr.vmem [resolvable:$true] %s37_s20 }
   0x8   :  { %43 = dma.hbm_to_vmem [thread:$0]  %s36_s16, 256, %s38_s20, [#allocation8], %s202_s17, %s202_s17, %s203_s18  }
   0x9   :  { %195 = dma.done.wait [#allocation5], 256  }
   0xa   :  { %196 = vsyncadd [#allocation5], 4294967040 }
   0xb   :  { %197 = dma.done.wait [#allocation8], 256  }
   0xc   :  { %198 = vsyncadd [#allocation8], 4294967040  ;;  %v205_v0 = vmov 0.0   ;;  %v62_v1 = vld [vmem:[#allocation4] sm:$0xff]  ;;  %v64_v2 = vld [vmem:[#allocation7] sm:$0xff]  ;;  %s206_s0 = smov [#allocation9]  }
   0xd   :  { %60 = vst [vmem:[#allocation2] sm:$0x1] %v205_v0  ;;  %v63_v3 = vld [vmem:[#allocation4 + $0x8] sm:$0xff]  ;;  %v65_v4 = vld [vmem:[#allocation7 + $0x8] sm:$0xff]  ;;  %v66_v5 = vcvt.s32.f32 %v64_v2  ;;  %s104_s1 = sshll.u32 %s206_s0, 4  ;;  %s106_s23 = sshll.u32 %s233_s2, 4  ;;  %s105_s1 = int_to_ptr.vmem [resolvable:$true] %s104_s1  ;;  %s107_s23 = int_to_ptr.hbm [resolvable:$true] %s106_s23 }
   0xe   :  { %61 = vst [vmem:[#allocation3] sm:$0x1] %v205_v0  ;;  %v67_v6 = vcvt.s32.f32 %v65_v4 }
   0xf   :  { %v69_v7 = vmul.f32 %v66_v5, %v62_v1  ;;  %v81_v8 = vadd.f32 %v66_v5, %v62_v1 }
  0x10   :  { %v70_v9 = vmul.f32 %v67_v6, %v63_v3  ;;  %v82_v10 = vadd.f32 %v67_v6, %v63_v3 }
  0x12   :  { %v71_v11 = vadd.f32 %v70_v9, %v69_v7  ;;  %v83_v12 = vadd.f32 %v82_v10, %v81_v8 }
  0x14   :  { %v72_v13 = vrot.slane %v71_v11, 4  ;;  %v84_v14 = vrot.slane %v83_v12, 4  ;;  %v68_v23 = vld [vmem:[#allocation2] sm:$0x1] }
  0x15   :  { %v80_v24 = vld [vmem:[#allocation3] sm:$0x1] }
  0x16   :  { %v73_v15 = vadd.f32 %v72_v13, %v71_v11  ;;  %v85_v16 = vadd.f32 %v84_v14, %v83_v12 }
  0x18   :  { %v74_v17 = vrot.slane %v73_v15, 2  ;;  %v86_v18 = vrot.slane %v85_v16, 2 }
  0x1a   :  { %v75_v19 = vadd.f32 %v74_v17, %v73_v15  ;;  %v87_v20 = vadd.f32 %v86_v18, %v85_v16 }
  0x1c   :  { %v76_v21 = vrot.slane %v75_v19, 1  ;;  %v88_v22 = vrot.slane %v87_v20, 1 }
  0x1e   :  { %v77_v25 = vadd.f32 %v76_v21, %v75_v19  ;;  %v89_v26 = vadd.f32 %v88_v22, %v87_v20 }
  0x20   :  { %v78_v27 = vadd.f32 %v77_v25, %v68_v23  ;;  %v90_v28 = vadd.f32 %v89_v26, %v80_v24 }
  0x22   :  { %79 = vst [vmem:[#allocation2] sm:$0x1] %v78_v27 }
  0x23   :  { %91 = vst [vmem:[#allocation3] sm:$0x1] %v90_v28 }
  0x29   :  { %v95_v29 = vld [vmem:[#allocation2] sm:$0x1] }
  0x2a   :  { %96 = vst [vmem:[#allocation9] sm:$0x1] %v95_v29  ;;  %v97_v30 = vld [vmem:[#allocation3] sm:$0x1] }
  0x2b   :  { %98 = vst [vmem:[#allocation9 + $0x1] sm:$0x1] %v97_v30 }
  0x2c   :  { %109 = dma.vmem_to_hbm [thread:$0]  %s105_s1, 32, %s107_s23, [#allocation6]  }
  0x2d   :  { %199 = dma.done.wait [#allocation6], 32  }
  0x2e   :  { %200 = vsyncadd [#allocation6], 4294967264 }
  0x2f   :  { %114 = vsyncpa [#allocation5], 1 }
  0x30   :  { %115 = vsyncpa [#allocation8], 1 }
  0x31   :  { %116 = vsyncpa [#allocation6], 1 }

</bundles_post_ra>
